<compile_context>
chip_gen: v7x
topology: tpu7x:2x2x1
jax: 0.10.0
libtpu: 0.0.40
codegen_flags: <defaults>
</compile_context>

<pallas_src>
import jax
import jax.numpy as jnp
from jax.experimental import pallas as pl
from jax.experimental.pallas import tpu as pltpu

INPUT_SIZE = 3
HIDDEN_SIZE = 3


def _rnn_cell_kernel_x(x_ref, w_ih_ref, b_ref, out_ref):
    """No-hidden-state path.  x_ref: (K, Bt)  w_ih_ref: (H, K)  b_ref: (H, 1)  out_ref: (H, Bt).

    out = tanh(W_ih @ x + b), computed as K unrolled VPU broadcast FMAs (MXU stays idle).
    """
    hidden = out_ref.shape[0]
    bt = x_ref.shape[1]
    w_ih = w_ih_ref[...].astype(jnp.float32)
    acc = jnp.zeros((hidden, bt), jnp.float32)
    for k in range(x_ref.shape[0]):                      # K = 3, static unroll
        acc = acc + w_ih[:, k:k + 1] * x_ref[k:k + 1, :].astype(jnp.float32)
    out_ref[...] = jnp.tanh(acc + b_ref[...]).astype(out_ref.dtype)


def _rnn_cell_kernel_xh(x_ref, h_ref, w_ih_ref, w_hh_ref, b_ref, out_ref):
    """With-hidden-state path: x and h arrive as separate inputs (no wrapper concat).

    out = tanh(W_ih @ x + W_hh @ h + b).
    """
    hidden = out_ref.shape[0]
    bt = x_ref.shape[1]
    w_ih = w_ih_ref[...].astype(jnp.float32)
    w_hh = w_hh_ref[...].astype(jnp.float32)
    acc = jnp.zeros((hidden, bt), jnp.float32)
    for k in range(x_ref.shape[0]):                      # K = 3, static unroll
        acc = acc + w_ih[:, k:k + 1] * x_ref[k:k + 1, :].astype(jnp.float32)
    for k in range(h_ref.shape[0]):                      # K = 3, static unroll
        acc = acc + w_hh[:, k:k + 1] * h_ref[k:k + 1, :].astype(jnp.float32)
    out_ref[...] = jnp.tanh(acc + b_ref[...]).astype(out_ref.dtype)


def prepare_params(w_ih, w_hh, b_ih, b_hh):
    """One-time packing of RNNCell parameters (hoisted out of the per-call path).

    w_ih : (hidden, input)   w_hh : (hidden, hidden)   b_ih, b_hh : (hidden,)
    In the lane-dense (transposed) layout the kernels consume W directly (no transpose needed);
    the two biases are fused once into a single (hidden, 1) column.
    """
    w_ih = jnp.asarray(w_ih, jnp.float32)
    w_hh = jnp.asarray(w_hh, jnp.float32)
    b = (jnp.asarray(b_ih, jnp.float32) + jnp.asarray(b_hh, jnp.float32)).reshape(-1, 1)
    return {"w_ih": w_ih, "w_hh": w_hh, "b": b}


def simple_rnn_cell(x, h, params, *, block_b=8192):
    """Forward of nn.RNNCell(input_size=3, hidden_size=3, nonlinearity='tanh').

    x : (batch, input_size)
    h : (batch, hidden_size) or None (-> zeros, PyTorch semantics)
    params : output of prepare_params()
    returns (batch, hidden_size)
    """
    batch, in_features = x.shape
    hidden = params["b"].shape[0]
    dtype = x.dtype

    # zero-size batch: nothing to compute — return the empty result (PyTorch does the same).
    if batch == 0:
        return jnp.zeros((0, hidden), dtype)

    # Lane-dense layout plumbing: batch on the last (lane) axis.
    x_t = x.T                                             # (in_features, batch)

    # Small batch -> one whole-array block (fast path); large batch -> 128-multiple lane tiles.
    bt = batch if batch <= block_b else block_b
    grid = (pl.cdiv(batch, bt),)

    def data_spec(rows):
        return pl.BlockSpec((rows, bt), lambda i: (0, i))

    def full_spec(shape):
        return pl.BlockSpec(shape, lambda i: (0, 0))

    compiler_params = pltpu.CompilerParams(dimension_semantics=("parallel",))
    out_shape = jax.ShapeDtypeStruct((hidden, batch), dtype)

    if h is None:
        # h == 0  =>  W_hh @ h == 0: single-input kernel, nothing extra to read.
        out_t = pl.pallas_call(
            _rnn_cell_kernel_x,
            out_shape=out_shape,
            grid=grid,
            in_specs=[data_spec(in_features),
                      full_spec(params["w_ih"].shape),
                      full_spec(params["b"].shape)],
            out_specs=data_spec(hidden),
            compiler_params=compiler_params,
        )(x_t, params["w_ih"], params["b"])
    else:
        h_t = h.T                                         # (hidden, batch)
        out_t = pl.pallas_call(
            _rnn_cell_kernel_xh,
            out_shape=out_shape,
            grid=grid,
            in_specs=[data_spec(in_features),
                      data_spec(hidden),
                      full_spec(params["w_ih"].shape),
                      full_spec(params["w_hh"].shape),
                      full_spec(params["b"].shape)],
            out_specs=data_spec(hidden),
            compiler_params=compiler_params,
        )(x_t, h_t, params["w_ih"], params["w_hh"], params["b"])

    return out_t.T                                        # back to (batch, hidden)


def init_params(key, input_size=INPUT_SIZE, hidden_size=HIDDEN_SIZE):
    """Deterministic init matching PyTorch RNNCell: U(-1/sqrt(hidden), 1/sqrt(hidden))."""
    k1, k2, k3, k4 = jax.random.split(key, 4)
    bound = 1.0 / jnp.sqrt(jnp.float32(hidden_size))
    u = lambda k, shape: jax.random.uniform(k, shape, jnp.float32, -bound, bound)
    w_ih = u(k1, (hidden_size, input_size))
    w_hh = u(k2, (hidden_size, hidden_size))
    b_ih = u(k3, (hidden_size,))
    b_hh = u(k4, (hidden_size,))
    return w_ih, w_hh, b_ih, b_hh


def _reference(x, h, w_ih, w_hh, b_ih, b_hh):
    if h is None:
        h = jnp.zeros((x.shape[0], w_hh.shape[0]), x.dtype)
    return jnp.tanh(x @ w_ih.T + b_ih + h @ w_hh.T + b_hh)


# TODO(synk): torch.manual_seed(33)/np.random.seed(33) in the module's forward are host-side
# RNG side effects with no effect on the output; there is no device-kernel equivalent.

if __name__ == "__main__":
    key = jax.random.PRNGKey(0)
    k_param, k_x, k_h, k_x2 = jax.random.split(key, 4)
    w_ih, w_hh, b_ih, b_hh = init_params(k_param)
    params = prepare_params(w_ih, w_hh, b_ih, b_hh)      # done once, not per call

    # module forward path: self.func(data) with no hidden state
    batch = 8
    x = jax.random.normal(k_x, (batch, INPUT_SIZE), jnp.float32)
    out = jax.block_until_ready(simple_rnn_cell(x, None, params))
    ref = _reference(x, None, w_ih, w_hh, b_ih, b_hh)
    assert out.shape == (batch, HIDDEN_SIZE)
    assert jnp.allclose(out, ref, atol=1e-5, rtol=1e-5)

    # explicit-hidden path: x and h passed separately, accumulated in-kernel (no concat)
    h = jax.random.normal(k_h, (batch, HIDDEN_SIZE), jnp.float32)
    out_h = jax.block_until_ready(simple_rnn_cell(x, h, params))
    ref_h = _reference(x, h, w_ih, w_hh, b_ih, b_hh)
    assert jnp.allclose(out_h, ref_h, atol=1e-5, rtol=1e-5)

    # exercise the batched grid path (several 128-lane tiles incl. a partial last block)
    batch2 = 300
    x2 = jax.random.normal(k_x2, (batch2, INPUT_SIZE), jnp.float32)
    out2 = jax.block_until_ready(simple_rnn_cell(x2, None, params, block_b=128))
    ref2 = _reference(x2, None, w_ih, w_hh, b_ih, b_hh)
    assert out2.shape == (batch2, HIDDEN_SIZE)
    assert jnp.allclose(out2, ref2, atol=1e-5, rtol=1e-5)

    # the "zero_size" case the PyTorch module is named after: batch = 0
    x0 = jnp.zeros((0, INPUT_SIZE), jnp.float32)
    out0 = jax.block_until_ready(simple_rnn_cell(x0, None, params))
    assert out0.shape == (0, HIDDEN_SIZE)

    print("KERNEL_OK")
</pallas_src>

<mosaic_0001>
module attributes {stable_mosaic.version = 11 : i64} {
  func.func @_rnn_cell_kernel_x(%arg0: i32, %arg1: memref<3x8xf32, #tpu.memory_space<vmem>>, %arg2: memref<3x3xf32, #tpu.memory_space<vmem>>, %arg3: memref<3x1xf32, #tpu.memory_space<vmem>>, %arg4: memref<3x8xf32, #tpu.memory_space<vmem>>) attributes {dimension_semantics = [#tpu.dimension_semantics<parallel>], iteration_bounds = array<i64: 1>, scalar_prefetch = 0 : i64, scratch_operands = 0 : i64, tpu.core_type = #tpu.core_type<tc>, window_params = [{transform_indices = @transform_0, window_bounds = array<i64: 3, 8>}, {pipeline_mode = #tpu.pipeline_mode<synchronous>, transform_indices = @transform_1, window_bounds = array<i64: 3, 3>}, {pipeline_mode = #tpu.pipeline_mode<synchronous>, transform_indices = @transform_2, window_bounds = array<i64: 3, 1>}, {transform_indices = @transform_3, window_bounds = array<i64: 3, 8>}]} {
    %c0 = arith.constant 0 : index
    %c0_0 = arith.constant 0 : index
    %0 = vector.load %arg2[%c0, %c0_0] : memref<3x3xf32, #tpu.memory_space<vmem>>, vector<3x3xf32>
    %cst = arith.constant 0.000000e+00 : f32
    %1 = vector.broadcast %cst : f32 to vector<3x8xf32>
    %2 = vector.extract_strided_slice %0 {offsets = [0, 0], sizes = [3, 1], strides = [1, 1]} : vector<3x3xf32> to vector<3x1xf32>
    %c0_1 = arith.constant 0 : index
    %c0_2 = arith.constant 0 : index
    %3 = vector.load %arg1[%c0_1, %c0_2] : memref<3x8xf32, #tpu.memory_space<vmem>>, vector<1x8xf32>
    %4 = vector.broadcast %2 : vector<3x1xf32> to vector<3x8xf32>
    %5 = vector.broadcast %3 : vector<1x8xf32> to vector<3x8xf32>
    %6 = arith.mulf %4, %5 : vector<3x8xf32>
    %7 = arith.addf %1, %6 : vector<3x8xf32>
    %8 = vector.extract_strided_slice %0 {offsets = [0, 1], sizes = [3, 1], strides = [1, 1]} : vector<3x3xf32> to vector<3x1xf32>
    %c1 = arith.constant 1 : index
    %c0_3 = arith.constant 0 : index
    %9 = vector.load %arg1[%c1, %c0_3] : memref<3x8xf32, #tpu.memory_space<vmem>>, vector<1x8xf32>
    %10 = vector.broadcast %8 : vector<3x1xf32> to vector<3x8xf32>
    %11 = vector.broadcast %9 : vector<1x8xf32> to vector<3x8xf32>
    %12 = arith.mulf %10, %11 : vector<3x8xf32>
    %13 = arith.addf %7, %12 : vector<3x8xf32>
    %14 = vector.extract_strided_slice %0 {offsets = [0, 2], sizes = [3, 1], strides = [1, 1]} : vector<3x3xf32> to vector<3x1xf32>
    %c2 = arith.constant 2 : index
    %c0_4 = arith.constant 0 : index
    %15 = vector.load %arg1[%c2, %c0_4] : memref<3x8xf32, #tpu.memory_space<vmem>>, vector<1x8xf32>
    %16 = vector.broadcast %14 : vector<3x1xf32> to vector<3x8xf32>
    %17 = vector.broadcast %15 : vector<1x8xf32> to vector<3x8xf32>
    %18 = arith.mulf %16, %17 : vector<3x8xf32>
    %19 = arith.addf %13, %18 : vector<3x8xf32>
    %c0_5 = arith.constant 0 : index
    %c0_6 = arith.constant 0 : index
    %20 = vector.load %arg3[%c0_5, %c0_6] : memref<3x1xf32, #tpu.memory_space<vmem>>, vector<3x1xf32>
    %21 = vector.broadcast %20 : vector<3x1xf32> to vector<3x8xf32>
    %22 = arith.addf %19, %21 : vector<3x8xf32>
    %23 = math.tanh %22 : vector<3x8xf32>
    %c0_7 = arith.constant 0 : index
    %c0_8 = arith.constant 0 : index
    %24 = vector.load %arg4[%c0_7, %c0_8] : memref<3x8xf32, #tpu.memory_space<vmem>>, vector<3x8xf32>
    tpu.vector_store %arg4[%c0_7, %c0_8], %23 {strides = array<i32>} : memref<3x8xf32, #tpu.memory_space<vmem>>, vector<3x8xf32>,
    return
  }
  func.func @transform_0(%arg0: i32) -> (i32, i32) {
    %c0_i32 = arith.constant 0 : i32
    %c0_i32_0 = arith.constant 0 : i32
    return %c0_i32, %arg0 : i32, i32
  }
  func.func @transform_1(%arg0: i32) -> (i32, i32) {
    %c0_i32 = arith.constant 0 : i32
    %c0_i32_0 = arith.constant 0 : i32
    %c0_i32_1 = arith.constant 0 : i32
    return %c0_i32, %c0_i32_0 : i32, i32
  }
  func.func @transform_2(%arg0: i32) -> (i32, i32) {
    %c0_i32 = arith.constant 0 : i32
    %c0_i32_0 = arith.constant 0 : i32
    %c0_i32_1 = arith.constant 0 : i32
    return %c0_i32, %c0_i32_0 : i32, i32
  }
  func.func @transform_3(%arg0: i32) -> (i32, i32) {
    %c0_i32 = arith.constant 0 : i32
    %c0_i32_0 = arith.constant 0 : i32
    return %c0_i32, %arg0 : i32, i32
  }
}

</mosaic_0001>

<bundles_post_ra>
// kernel: tpu_custom_call.1
= control target key start
LH: loop header
LB: loop body
LE: loop exit
PB: predicated region body
PF: predicated region fallthrough
CT: control target
= control target key end

     0   :  { %v112_v1 = vmov 0   ;;  %v113_v2 = vmov 2   ;;  %s163_s0 = inlined_call_operand.vmem [shape: f32[3,8], index: 0, kind: input, shape index: {}]   ;;  %s164_s1 = inlined_call_operand.vmem [shape: f32[3,3], index: 1, kind: input, shape index: {}]   ;;  %s165_s2 = inlined_call_operand.vmem [shape: f32[3,1], index: 2, kind: input, shape index: {}]   ;;  %s166_s3 = inlined_call_operand.hbm [shape: f32[3,8], index: 3, kind: output, shape index: {}]  }
   0x1   :  { %v15_v0 = vld [vmem:[%s164_s1] sm:$0x7]  ;;  %81 = vset.pattern.permute.xlu0 %v112_v1  ;;  %83 = vset.pattern.permute.xlu1 %v113_v2 }
   0x2   :  { %8 = vsyncpa [#allocation3], 0  ;;  %19 = vperm.xlu0 %81, %v15_v0   ;;  %41 = vperm.xlu1 %83, %v15_v0   ;;  %v50_v3 = vld [vmem:[%s165_s2] sm:$0x7]  ;;  %v114_v4 = vmov 1   ;;  %s115_s2 = smov [#allocation2]  }
   0x3   :  { %v74_v6 = vld [vmem:[%s163_s0] ss:$0 sm:$0xff]  ;;  %v75_v7 = vld [vmem:[%s163_s0 + $0x1] ss:$0 sm:$0xff]  ;;  %v76_v8 = vld [vmem:[%s163_s0 + $0x2] ss:$0 sm:$0xff] }
   0x4   :  { %s66_s21 = sshll.u32 %s115_s2, 4  ;;  %vm58_vm0 = vcmask 59392   ;;  %s67_s21 = int_to_ptr.vmem [resolvable:$true] %s66_s21 }
   0x5   :  { %s88_s22 = scalar_lea.vmem %s67_s21, 64  ;;  %p93_p1 = scmp.lt.s32.totalorder %s67_s21, %s67_s21 }
   0x6   :  { %82 = vset.pattern.permute.xlu0 %v114_v4  ;;  %84 = vset.pattern.permute.xlu1 %v112_v1  ;;  %p89_p0 = scmp.ne.s32.totalorder %s67_s21, %s88_s22  ;;  %p94_p2 = scmp.lt.s32.totalorder %s88_s22, %s88_s22 }
   0x7   :  { %30 = vperm.xlu0 %82, %v15_v0   ;;  %53 = vperm.xlu1 %84, %v50_v3  }
   0x8   :  { %p95_p3 = por %p94_p2, %p93_p1 }
   0xa   :  { %p96_p4 = pnand %p95_p3, %p89_p0 }
   0xb   :  { %85 = vset.pattern.permute.xlu0 %v112_v1 }
  0x81   :  { %v20_v5 = vpop.permute.xlu0 %19  ;;  %v42_v9 = vpop.permute.xlu1 %41 }
  0x82   :  { %v26_v11 = vmul.f32 %v74_v6, %v20_v5  ;;  %v48_v13 = vmul.f32 %v76_v8, %v42_v9 }
  0x86   :  { %v31_v10 = vpop.permute.xlu0 %30  ;;  %v54_v15 = vpop.permute.xlu1 %53 }
  0x87   :  { %v37_v12 = vmul.f32 %v75_v7, %v31_v10 }
  0x89   :  { %v38_v14 = vadd.f32 %v37_v12, %v26_v11 }
  0x8b   :  { %v49_v16 = vadd.f32 %v48_v13, %v38_v14 }
  0x8d   :  { %v56_v17 = vadd.f32 %v54_v15, %v49_v16 }
  0x8f   :  { %86 = vtanh.f32 %v56_v17 }
  0x99   :  { %v87_v18 = vpop.eup %86 }
  0x9a   :  { %59 = vst.msk [vmem:[#allocation2] sm:$0x7] %vm58_vm0, %v87_v18 }
  0x9b   :  { %99 = shalt.err (!%p96_p4)
}
  0x9c   :  { %s100_s24 = scalar_lea.hbm %s166_s3, 64 }
  0x9d   :  { %p101_p5 = scmp.ne.s32.totalorder %s166_s3, %s100_s24  ;;  %p104_p6 = scmp.lt.u32.totalorder %s100_s24, %s166_s3 }
  0x9f   :  { %p106_p7 = pnand %p104_p6, %p101_p5 }
  0xa1   :  { %109 = shalt.err (!%p106_p7)
}
  0xa2   :  { %69 = dma.vmem_to_hbm [thread:$0]  %s67_s21, 64, %s166_s3, [#allocation3]  }
  0xa3   :  { %110 = dma.done.wait [#allocation3], 64  }
  0xa4   :  { %111 = vsyncadd [#allocation3], 4294967232 }
  0xa5   :  { %73 = vsyncpa [#allocation3], 1 }

</bundles_post_ra>
